<compile_context>
chip_gen: v7x
topology: tpu7x:2x2x1
jax: 0.10.0
libtpu: 0.0.40
codegen_flags: <defaults>
</compile_context>

<pallas_src>
import functools

import jax
import jax.numpy as jnp
import numpy as np
from jax.experimental import pallas as pl
from jax.experimental.pallas import tpu as pltpu


# ----------------------------- chip-aware helpers -----------------------------

def _vmem_capacity_bytes():
    # Trace-time hardware query; fall back to the 128-MiB (v5e/v6e) value if
    # the query is unavailable.
    try:
        return int(pltpu.get_tpu_info().vmem_capacity_bytes)
    except Exception:
        return 128 * 1024 * 1024


def _pick_tile(n, cap):
    # Largest "nice" tile <= cap that divides n; fall back to the full extent
    # (full-dim blocks bypass the (8, 128) divisibility requirement).
    for t in (512, 256, 128):
        if t <= cap and n % t == 0:
            return t
    return n


def _pick_n_tile(n):
    for t in (1024, 896, 768, 640, 512, 384, 256, 128):
        if n % t == 0:
            return t
    return n


# --------------------------- linear (matmul + bias) ---------------------------

def _linear_kernel(x_ref, w_ref, b_ref, o_ref):
    # bf16 MXU inputs, f32 accumulation: for ViT-scale M the projections are
    # MXU-compute-bound (weights fully reused), so f32 matmul would leave
    # 3-7x of MXU throughput on the table.
    acc = jnp.dot(x_ref[...].astype(jnp.bfloat16), w_ref[...],
                  preferred_element_type=jnp.float32)
    o_ref[...] = (acc + b_ref[...]).astype(o_ref.dtype)


def linear(x, w_bf16, b, *, out_dtype, tm=256):
    """x: (M, K); w_bf16: (K, N) bf16; b: (N,) f32 -> (M, N) out_dtype."""
    M, K = x.shape
    Kw, Nout = w_bf16.shape
    assert K == Kw
    tm = min(tm, M)
    tn = _pick_n_tile(Nout)
    vmem_cap = _vmem_capacity_bytes()
    # The N axis is the OUTER grid axis: the weight block index is constant
    # across the inner M loop, so each weight tile is DMA'd once (one pass
    # over the weight), while x tiles are re-streamed per N tile.
    return pl.pallas_call(
        _linear_kernel,
        out_shape=jax.ShapeDtypeStruct((M, Nout), out_dtype),
        grid_spec=pltpu.PrefetchScalarGridSpec(
            num_scalar_prefetch=0,
            grid=(Nout // tn, pl.cdiv(M, tm)),
            in_specs=[
                pl.BlockSpec((tm, K), lambda j, i: (i, 0)),
                pl.BlockSpec((K, tn), lambda j, i: (0, j)),
                pl.BlockSpec((1, tn), lambda j, i: (0, j)),
            ],
            out_specs=pl.BlockSpec((tm, tn), lambda j, i: (i, j)),
        ),
        compiler_params=pltpu.CompilerParams(
            dimension_semantics=("parallel", "parallel"),
            vmem_limit_bytes=min(64 * 1024 * 1024, int(vmem_cap * 0.5)),
        ),
    )(x, w_bf16, b.reshape(1, Nout))


# --------------------------- attention core (flash-style) ---------------------

def _attn_kernel(*refs, num_heads, head_dim, C, use_rel_pos, split_qkv):
    if split_qkv:
        q_ref, k_ref, v_ref = refs[0], refs[1], refs[2]
        rest = refs[3:]
        k_base, v_base = 0, 0
    else:
        q_ref, kv_ref = refs[0], refs[1]
        k_ref = v_ref = kv_ref
        rest = refs[2:]
        k_base, v_base = C, 2 * C
    if use_rel_pos:
        rel_ref, e_ref = rest[0], rest[1]
        rest = rest[2:]
    o_ref, m_s, l_s, acc_s = rest

    kv = pl.program_id(2)

    @pl.when(kv == 0)
    def _init():
        m_s[...] = jnp.full(m_s.shape, -jnp.inf, m_s.dtype)
        l_s[...] = jnp.zeros(l_s.shape, l_s.dtype)
        acc_s[...] = jnp.zeros(acc_s.shape, acc_s.dtype)

    if use_rel_pos:
        e = e_ref[...]                      # (H+W, tk) bf16, exact one-hot

    # All heads of one image per grid step -> lane-dense (tq, C) accumulator.
    # num_heads is small, so a fully unrolled loop keeps the LLO scheduler busy.
    for h in range(num_heads):
        cq = h * head_dim
        # qkv is stored bf16 and the softmax scale is already folded into the
        # K columns of w_qkv, so q/k/v are MXU-ready with no per-step VALU work.
        q = q_ref[0, :, cq:cq + head_dim]                            # (tq, hd)
        k = k_ref[0, :, k_base + cq:k_base + cq + head_dim]          # (tk, hd)
        v = v_ref[0, :, v_base + cq:v_base + cq + head_dim]          # (tk, hd)

        # Contract the last dims directly: no k.T materialization / XLU copy.
        s = jax.lax.dot_general(q, k, (((1,), (1,)), ((), ())),
                                preferred_element_type=jnp.float32)  # (tq, tk)
        if use_rel_pos:
            # Single merged rel-pos bias matmul: rel = [rel_h | rel_w] (bf16),
            # e = [eh ; ew] one-hot expansion onto this key tile.
            s += jnp.dot(rel_ref[0, h], e, preferred_element_type=jnp.float32)

        # online softmax update (f32); m/l packed lane-wise as (tq, nh)
        m_prev = m_s[:, h:h + 1]
        m_new = jnp.maximum(m_prev, jnp.max(s, axis=-1, keepdims=True))
        alpha = jnp.exp(m_prev - m_new)
        p = jnp.exp(s - m_new)
        l_s[:, h:h + 1] = alpha * l_s[:, h:h + 1] + jnp.sum(p, axis=-1,
                                                            keepdims=True)
        m_s[:, h:h + 1] = m_new

        pv = jnp.dot(p.astype(jnp.bfloat16), v,
                     preferred_element_type=jnp.float32)             # (tq, hd)
        acc_s[:, cq:cq + head_dim] = alpha * acc_s[:, cq:cq + head_dim] + pv

    @pl.when(kv == pl.num_programs(2) - 1)
    def _finalize():
        for h in range(num_heads):
            cq = h * head_dim
            inv = pl.reciprocal(l_s[:, h:h + 1], approx=True)        # EUP slot
            o_ref[0, :, cq:cq + head_dim] = (
                acc_s[:, cq:cq + head_dim] * inv).astype(o_ref.dtype)


def attn_core(qkv, rel, e, *, num_heads, use_rel_pos, tq=None, tk=None):
    """qkv: (B, N, 3C) bf16 (K columns pre-scaled);
    rel: (B, nh, N, H+W) bf16 or None; e: (H+W, N) bf16 or None.
    Returns (B, N, C) bf16."""
    B, N, threeC = qkv.shape
    C = threeC // 3
    hd = C // num_heads

    vmem_cap = _vmem_capacity_bytes()
    small_vmem = vmem_cap < 100 * 1024 * 1024        # v7x: 64 MiB per TC
    tile_cap = 256 if small_vmem else 512
    tq = _pick_tile(N, tile_cap) if tq is None else tq
    tk = _pick_tile(N, tile_cap) if tk is None else tk
    assert N % tq == 0 and N % tk == 0

    # q/k/v as three column windows of qkv (streamed kv drops from 3C to 2C
    # columns, resident q from 3C to C).  Column-windowed blocks need the last
    # dim to satisfy the 128-lane tiling, so fall back to 3C slabs otherwise.
    split_qkv = (C % 128 == 0)

    kern = functools.partial(_attn_kernel, num_heads=num_heads, head_dim=hd,
                             C=C, use_rel_pos=use_rel_pos, split_qkv=split_qkv)

    if split_qkv:
        in_specs = [
            pl.BlockSpec((1, tq, C), lambda b, qi, kv: (b, qi, 0)),  # q resident
            pl.BlockSpec((1, tk, C), lambda b, qi, kv: (b, kv, 1)),  # k streamed
            pl.BlockSpec((1, tk, C), lambda b, qi, kv: (b, kv, 2)),  # v streamed
        ]
        args = [qkv, qkv, qkv]
    else:
        in_specs = [
            pl.BlockSpec((1, tq, 3 * C), lambda b, qi, kv: (b, qi, 0)),
            pl.BlockSpec((1, tk, 3 * C), lambda b, qi, kv: (b, kv, 0)),
        ]
        args = [qkv, qkv]

    if use_rel_pos:
        HW = rel.shape[-1]
        in_specs += [
            pl.BlockSpec((1, num_heads, tq, HW), lambda b, qi, kv: (b, 0, qi, 0)),
            pl.BlockSpec((HW, tk), lambda b, qi, kv: (0, kv)),
        ]
        args += [rel, e]
    # else: the rel/e streams are not declared at all -> no wasted DMA.

    return pl.pallas_call(
        kern,
        out_shape=jax.ShapeDtypeStruct((B, N, C), jnp.bfloat16),
        grid_spec=pltpu.PrefetchScalarGridSpec(
            num_scalar_prefetch=0,
            grid=(B, N // tq, N // tk),
            in_specs=in_specs,
            out_specs=pl.BlockSpec((1, tq, C), lambda b, qi, kv: (b, qi, 0)),
            scratch_shapes=[
                pltpu.VMEM((tq, num_heads), jnp.float32),   # running max
                pltpu.VMEM((tq, num_heads), jnp.float32),   # running sum
                pltpu.VMEM((tq, C), jnp.float32),           # lane-dense acc
            ],
        ),
        compiler_params=pltpu.CompilerParams(
            dimension_semantics=("parallel", "parallel", "arbitrary"),
            vmem_limit_bytes=min(100 * 1024 * 1024, int(vmem_cap * 0.8)),
        ),
    )(*args)


# --------------------------- JAX glue ------------------------------------------

def get_rel_pos(q_size, k_size, rel_pos):
    max_rel_dist = int(2 * max(q_size, k_size) - 1)
    # TODO(synk): F.interpolate (linear resize) branch for mismatched rel_pos
    # length is not implemented; parameters here always have max_rel_dist rows.
    assert rel_pos.shape[0] == max_rel_dist
    q_coords = jnp.arange(q_size)[:, None] * max(k_size / q_size, 1.0)
    k_coords = jnp.arange(k_size)[None, :] * max(q_size / k_size, 1.0)
    rel = q_coords - k_coords + (k_size - 1) * max(q_size / k_size, 1.0)
    return rel_pos[rel.astype(jnp.int32)]


def attention_forward(x, params, *, num_heads, use_rel_pos=True, tq=None, tk=None):
    B, H, W, C = x.shape
    N = H * W
    hd = C // num_heads
    scale = hd ** (-0.5)

    # Fold the softmax scale into the K columns only ((q*scale)@k^T == q@(scale*k)^T);
    # q must stay unscaled because the rel-pos einsums below use unscaled q.
    col_scale = jnp.concatenate([jnp.ones((C,), jnp.float32),
                                 jnp.full((C,), scale, jnp.float32),
                                 jnp.ones((C,), jnp.float32)])
    w_qkv = (params["w_qkv"] * col_scale[None, :]).astype(jnp.bfloat16)
    b_qkv = params["b_qkv"] * col_scale
    w_proj = params["w_proj"].astype(jnp.bfloat16)

    # qkv projection -> bf16 (the attention kernel feeds the MXU in bf16, so
    # f32 storage would only cost HBM bytes and VMEM).
    qkv = linear(x.reshape(B * N, C), w_qkv, b_qkv, out_dtype=jnp.bfloat16)
    qkv = qkv.reshape(B, N, 3 * C)

    if use_rel_pos:
        Rh = get_rel_pos(H, H, params["rel_pos_h"])              # (H, H, hd)
        Rw = get_rel_pos(W, W, params["rel_pos_w"])              # (W, W, hd)
        q5 = qkv[:, :, :C].reshape(B, H, W, num_heads, hd)       # unscaled q view
        rel_h = jnp.einsum("bhwnc,hkc->bnhwk", q5, Rh).reshape(B, num_heads, N, H)
        rel_w = jnp.einsum("bhwnc,wkc->bnhwk", q5, Rw).reshape(B, num_heads, N, W)
        # Merged bias table (bf16) + merged one-hot expansion matrix:
        #   bias[q, k] = rel_h[q, k // W] + rel_w[q, k % W] = rel[q, :] @ e[:, k]
        rel = jnp.concatenate([rel_h, rel_w], axis=-1).astype(jnp.bfloat16)
        key_idx = jnp.arange(N)
        eh = key_idx[None, :] // W == jnp.arange(H)[:, None]
        ew = key_idx[None, :] % W == jnp.arange(W)[:, None]
        e = jnp.concatenate([eh, ew], axis=0).astype(jnp.bfloat16)   # (H+W, N)
    else:
        rel = None
        e = None

    o = attn_core(qkv, rel, e, num_heads=num_heads, use_rel_pos=use_rel_pos,
                  tq=tq, tk=tk)                                   # (B, N, C) bf16

    out = linear(o.reshape(B * N, C), w_proj, params["b_proj"], out_dtype=x.dtype)
    return out.reshape(B, H, W, C)


# Pure-JAX reference mirroring the PyTorch forward exactly (f32 everywhere).
def attention_reference(x, params, *, num_heads, use_rel_pos=True):
    B, H, W, C = x.shape
    N = H * W
    hd = C // num_heads
    scale = hd ** (-0.5)
    qkv = x.reshape(B, N, C) @ params["w_qkv"] + params["b_qkv"]
    qkv = qkv.reshape(B, N, 3, num_heads, hd).transpose(2, 0, 3, 1, 4)
    qkv = qkv.reshape(3, B * num_heads, N, hd)
    q, k, v = qkv[0], qkv[1], qkv[2]
    attn = (q * scale) @ jnp.swapaxes(k, -1, -2)
    if use_rel_pos:
        Rh = get_rel_pos(H, H, params["rel_pos_h"])
        Rw = get_rel_pos(W, W, params["rel_pos_w"])
        r_q = q.reshape(B * num_heads, H, W, hd)
        rel_h = jnp.einsum("bhwc,hkc->bhwk", r_q, Rh)
        rel_w = jnp.einsum("bhwc,wkc->bhwk", r_q, Rw)
        attn = (attn.reshape(B * num_heads, H, W, H, W)
                + rel_h[:, :, :, :, None] + rel_w[:, :, :, None, :]
                ).reshape(B * num_heads, N, N)
    attn = jax.nn.softmax(attn, axis=-1)
    o = (attn @ v).reshape(B, num_heads, H, W, hd)
    o = o.transpose(0, 2, 3, 1, 4).reshape(B, H, W, C)
    return o @ params["w_proj"] + params["b_proj"]


# --------------------------- main -----------------------------------------------

if __name__ == "__main__":
    # C = 128 so the split q/k/v column-window path (C % 128 == 0) is the one
    # exercised, matching real ViT widths (768 / 1024 / 1280).
    B, H, W, C = 2, 16, 16, 128
    num_heads = 4
    hd = C // num_heads

    key = jax.random.PRNGKey(0)
    ks = jax.random.split(key, 7)
    params = {
        "w_qkv":  0.05 * jax.random.normal(ks[0], (C, 3 * C), jnp.float32),
        "b_qkv":  0.02 * jax.random.normal(ks[1], (3 * C,), jnp.float32),
        "w_proj": 0.05 * jax.random.normal(ks[2], (C, C), jnp.float32),
        "b_proj": 0.02 * jax.random.normal(ks[3], (C,), jnp.float32),
        # use_rel_pos=True path; non-zero init so the rel-pos branch is exercised.
        "rel_pos_h": 0.02 * jax.random.normal(ks[4], (2 * H - 1, hd), jnp.float32),
        "rel_pos_w": 0.02 * jax.random.normal(ks[5], (2 * W - 1, hd), jnp.float32),
    }
    x = jax.random.normal(ks[6], (B, H, W, C), jnp.float32)

    # tq=tk=128 so the toy size (N=256) exercises the multi-tile online-softmax
    # path (2 q tiles x 2 kv tiles per image); defaults pick chip-aware tiles.
    out = attention_forward(x, params, num_heads=num_heads, use_rel_pos=True,
                            tq=128, tk=128)
    out = jax.block_until_ready(out)

    ref = attention_reference(x, params, num_heads=num_heads, use_rel_pos=True)
    # bf16 projections + bf16 QK/PV/rel-pos matmuls + approx reciprocal vs. the
    # f32 reference -> slightly looser tolerance than a pure-f32 kernel.
    np.testing.assert_allclose(np.asarray(out), np.asarray(ref),
                               rtol=3e-3, atol=3e-3)
    print("KERNEL_OK")
</pallas_src>

<mosaic_0001>
module attributes {stable_mosaic.version = 11 : i64} {
  func.func @_linear_kernel(%arg0: i32, %arg1: i32, %arg2: memref<256x128xf32, #tpu.memory_space<vmem>>, %arg3: memref<128x384xbf16, #tpu.memory_space<vmem>>, %arg4: memref<1x384xf32, #tpu.memory_space<vmem>>, %arg5: memref<256x384xbf16, #tpu.memory_space<vmem>>) attributes {dimension_semantics = [#tpu.dimension_semantics<parallel>, #tpu.dimension_semantics<parallel>], iteration_bounds = array<i64: 1, 2>, scalar_prefetch = 0 : i64, scratch_operands = 0 : i64, tpu.core_type = #tpu.core_type<tc>, window_params = [{transform_indices = @transform_0, window_bounds = array<i64: 256, 128>}, {transform_indices = @transform_1, window_bounds = array<i64: 128, 384>}, {transform_indices = @transform_2, window_bounds = array<i64: 1, 384>}, {transform_indices = @transform_3, window_bounds = array<i64: 256, 384>}]} {
    %c0 = arith.constant 0 : index
    %c0_0 = arith.constant 0 : index
    %0 = vector.load %arg2[%c0, %c0_0] : memref<256x128xf32, #tpu.memory_space<vmem>>, vector<256x128xf32>
    %1 = arith.truncf %0 : vector<256x128xf32> to vector<256x128xbf16>
    %c0_1 = arith.constant 0 : index
    %c0_2 = arith.constant 0 : index
    %2 = vector.load %arg3[%c0_1, %c0_2] : memref<128x384xbf16, #tpu.memory_space<vmem>>, vector<128x384xbf16>
    %cst = arith.constant dense<0.000000e+00> : vector<256x384xf32>
    %3 = tpu.matmul %1, %2, %cst {dimension_numbers = #tpu.dot_dimension_numbers<[1], [0], [0], [1], [0, 0, 1, 1], [], []>} : vector<256x128xbf16>, vector<128x384xbf16>, vector<256x384xf32> -> vector<256x384xf32>
    %c0_3 = arith.constant 0 : index
    %c0_4 = arith.constant 0 : index
    %4 = vector.load %arg4[%c0_3, %c0_4] : memref<1x384xf32, #tpu.memory_space<vmem>>, vector<1x384xf32>
    %5 = vector.broadcast %4 : vector<1x384xf32> to vector<256x384xf32>
    %6 = arith.addf %3, %5 : vector<256x384xf32>
    %7 = arith.truncf %6 : vector<256x384xf32> to vector<256x384xbf16>
    %c0_5 = arith.constant 0 : index
    %c0_6 = arith.constant 0 : index
    %8 = vector.load %arg5[%c0_5, %c0_6] : memref<256x384xbf16, #tpu.memory_space<vmem>>, vector<256x384xbf16>
    tpu.vector_store %arg5[%c0_5, %c0_6], %7 {strides = array<i32>} : memref<256x384xbf16, #tpu.memory_space<vmem>>, vector<256x384xbf16>,
    return
  }
  func.func @transform_0(%arg0: i32, %arg1: i32) -> (i32, i32) {
    %c0_i32 = arith.constant 0 : i32
    %c0_i32_0 = arith.constant 0 : i32
    return %arg1, %c0_i32 : i32, i32
  }
  func.func @transform_1(%arg0: i32, %arg1: i32) -> (i32, i32) {
    %c0_i32 = arith.constant 0 : i32
    %c0_i32_0 = arith.constant 0 : i32
    return %c0_i32, %arg0 : i32, i32
  }
  func.func @transform_2(%arg0: i32, %arg1: i32) -> (i32, i32) {
    %c0_i32 = arith.constant 0 : i32
    %c0_i32_0 = arith.constant 0 : i32
    return %c0_i32, %arg0 : i32, i32
  }
  func.func @transform_3(%arg0: i32, %arg1: i32) -> (i32, i32) {
    %c0_i32 = arith.constant 0 : i32
    return %arg1, %arg0 : i32, i32
  }
}

</mosaic_0001>

<bundles_post_ra>
// kernel: tpu_custom_call.1
= control target key start
LH: loop header
LB: loop body
LE: loop exit
PB: predicated region body
PF: predicated region fallthrough
CT: control target
= control target key end

     0   :  { %8 = vsyncpa [#allocation3], 0  ;;  %s2429_s0 = inlined_call_operand.hbm [shape: f32[512,128], index: 0, kind: input, shape index: {}]   ;;  %s2430_s1 = inlined_call_operand.hbm [shape: bf16[128,384], index: 1, kind: input, shape index: {}]   ;;  %s2431_s2 = inlined_call_operand.hbm [shape: f32[1,384], index: 2, kind: input, shape index: {}]   ;;  %s2432_s3 = inlined_call_operand.hbm [shape: bf16[512,384], index: 3, kind: output, shape index: {}]  }
   0x1   :  { %10 = vsyncpa [#allocation3 + $0x1], 0 }
   0x2   :  { %11 = vsyncpa [#allocation6], 0 }
   0x3   :  { %12 = vsyncpa [#allocation4], 0 }
   0x4   :  { %14 = vsyncpa [#allocation4 + $0x1], 0  ;;  %s1927_s12 = smov 0   ;;  %s1929_s13 = smov 0  }
   0x5   :  { %s1931_s14 = smov 0   ;;  %s1933_s15 = smov 0  }
   0x6   :  { %s1935_s16 = smov 0   ;;  %s1937_s17 = smov 0  }
   0x7 LB: > { %s1339_s18 = sadd.s32 4294967295, %s1894_s17   ;;  %s1340_s19 = sadd.s32 4294967294, %s1894_s17   ;;  %s1894_s17 = sphi %s1937_s17, %s20_s17   ;;  %s1890_s16 = sphi %s1935_s16, %s2454_s16   ;;  %s1886_s15 = sphi %s1933_s15, %s2453_s15   ;;  %s1882_s14 = sphi %s1931_s14, %s2452_s14   ;;  %s1878_s13 = sphi %s1929_s13, %s2451_s13   ;;  %s1874_s12 = sphi %s1927_s12, %s2450_s12  }
   0x8   : > { %p52_p0 = scmp.ne.s32.totalorder %s1878_s13, %s1874_s12  ;;  %p1961_p1 = scmp.eq.s32.totalorder %s1339_s18, 0 }
   0x9   : > { %p1965_p2 = scmp.eq.s32.totalorder %s1339_s18, 1  ;;  %p136_p3 = scmp.eq.s32.totalorder %s1340_s19, 1 }
   0xa   : > { %s2437_s20 = scalar_select %p1961_p1, 1, 0 }
   0xb   : > { %p1971_p4 = por %p1961_p1, %p52_p0  ;;  %p1341_p5 = scmp.ge.s32.totalorder %s1894_s17, 1 }
   0xc   : > { %p1976_p6 = por %p136_p3, %p52_p0  ;;  %p143_p7 = scmp.lt.s32.totalorder %s1894_s17, 3 }
   0xd   : > { %s2439_s22 = scalar_select %p1971_p4, 1, 0 }
   0xe   : > { %s2440_s23 = scalar_select %p1976_p6, 1, 0 }
   0xf   : > { %p1981_p8 = pnand %p1341_p5, %p143_p7  ;;  %s1896_s25 = smov [#allocation5]  }
  0x10   : > { %s158_s26 = sshll.u32 %s1896_s25, 4  ;;  %s1897_s28 = smov [#allocation7]   ;;  %s1985_s26 = int_to_ptr.vmem [resolvable:$true] %s158_s26 }
  0x11   : > { %p1612_p9 = pneg %p1981_p8  ;;  %s175_s29 = sshll.u32 %s1897_s28, 4  ;;  %s1996_s29 = int_to_ptr.vmem [resolvable:$true] %s175_s29 }
  0x12   : > { %s1722_s5 = scalar_lea.hbm %s2430_s1, 3072 }
  0x13   : > { %p1992_p11 = pnand %p1612_p9, %p1961_p1  ;;  %p1723_p12 = scmp.ne.s32.totalorder %s2430_s1, %s1722_s5 }
  0x14   : > { %p1729_p5 = scmp.lt.u32.totalorder %s1722_s5, %s2430_s1 }
  0x15   : > { %p1724_p13 = pneg %p1992_p11 }
  0x17   : > { %p1725_p0 = pnand %p1724_p13, %p1723_p12 }
  0x19   : > { %p1726_p3 = pneg %p1725_p0 }
  0x1b   : > { %p1731_p7 = pnand %p1729_p5, %p1726_p3 }
  0x1d   : > { %1734 = shalt.err (!%p1731_p7)
}
  0x1e   : > { %s1735_s10 = scalar_lea.vmem %s1985_s26, 3072  ;;  %p1743_p1 = scmp.lt.s32.totalorder %s1985_s26, %s1985_s26 }
  0x1f   : > { %p1736_p9 = scmp.ne.s32.totalorder %s1985_s26, %s1735_s10  ;;  %p1744_p12 = scmp.lt.s32.totalorder %s1735_s10, %s1735_s10 }
  0x21   : > { %p1738_p10 = pnand %p1736_p9, %p1724_p13  ;;  %p1745_p0 = por %p1744_p12, %p1743_p1 }
  0x23   : > { %p1739_p6 = pneg %p1738_p10 }
  0x25   : > { %p1746_p4 = pnand %p1745_p0, %p1739_p6 }
  0x27   : > { %1749 = shalt.err (!%p1746_p4)
}
  0x28   : > { %s1898_s11 = smov 192   ;;  %s1899_s18 = smov 12  }
  0x29   : > { %1615 = dma.hbm_to_vmem [thread:$0]  (!%p1992_p11), %s2430_s1, 3072, %s1985_s26, [#allocation6], %s1898_s11, %s1898_s11, %s1899_s18  }
  0x2a   : > { %s1750_s4 = scalar_lea.hbm %s2431_s2, 48 }
  0x2b   : > { %p1751_p1 = scmp.ne.s32.totalorder %s2431_s2, %s1750_s4  ;;  %p1757_p10 = scmp.lt.u32.totalorder %s1750_s4, %s2431_s2 }
  0x2d   : > { %p1753_p4 = pnand %p1751_p1, %p1724_p13 }
  0x2f   : > { %p1754_p6 = pneg %p1753_p4 }
  0x31   : > { %p1759_p3 = pnand %p1757_p10, %p1754_p6 }
  0x33   : > { %1762 = shalt.err (!%p1759_p3)
}
  0x34   : > { %s1763_s26 = scalar_lea.vmem %s1996_s29, 48  ;;  %s1770_s9 = scalar_lea.vmem %s1996_s29, 64 }
  0x35   : > { %p1764_p5 = scmp.ne.s32.totalorder %s1996_s29, %s1763_s26  ;;  %p1771_p12 = scmp.lt.s32.totalorder %s1996_s29, %s1996_s29 }
  0x36   : > { %p1772_p0 = scmp.lt.s32.totalorder %s1770_s9, %s1763_s26 }
  0x37   : > { %p1766_p7 = pnand %p1764_p5, %p1724_p13 }
  0x38   : > { %p1773_p1 = por %p1772_p0, %p1771_p12 }
  0x39   : > { %p1767_p9 = pneg %p1766_p7 }
  0x3b   : > { %p1774_p4 = pnand %p1773_p1, %p1767_p9 }
  0x3d   : > { %1777 = shalt.err (!%p1774_p4)
}
  0x3e   : > { %1618 = dma.hbm_to_vmem [thread:$0]  (!%p1992_p11), %s2431_s2, 48, %s1996_s29, [#allocation6]  }
  0x3f   : > { %s29_s18 = sadd.s32 1, %s1890_s16  ;;  %s39_s19 = sadd.s32 1, %s1882_s14 }
  0x40   : > { %p30_p13 = scmp.ge.s32.totalorder %s29_s18, 2  ;;  %p46_p6 = scmp.ne.s32.totalorder %s1882_s14, %s1878_s13 }
  0x41   : > { %p47_p10 = scmp.eq.s32.totalorder %s1894_s17, 0  ;;  %p1629_p3 = scmp.lt.s32.totalorder %s1894_s17, 2 }
  0x42   : > { %s2456_s18 = smov (%p30_p13, %s29_s18), 0  ;;  %p2061_p7 = por %p1965_p2, %p46_p6 }
  0x43   : > { %p48_p5 = por %p47_p10, %p46_p6  ;;  %s36_s25 = ssub.s32 %s1890_s16, %s2456_s18 }
  0x44   : > { %s2443_s27 = scalar_select %p2061_p7, 1, 0 }
  0x45   : > { %s186_s28 = sand.u32 1, %s1882_s14   ;;  %p37_p9 = scmp.eq.s32.totalorder %s36_s25, 0 }
  0x46   : > { %s1345_s29 = sshll.u32 %s186_s28, 8  ;;  %s1445_s30 = sshll.u32 %s1890_s16, 12 }
  0x47   : > { %s2070_s4 = scalar_select %p37_p9, %s1882_s14, %s39_s19  }
  0x48   : > { %s2075_s7 = scalar_lea.hbm %s2429_s0, %s1445_s30  ;;  %s190_s21 = scalar_lea.vmem [#allocation2], %s1345_s29 }
  0x49   : > { %s197_s8 = sshll.u32 %s190_s21, 4  ;;  %p2079_p2 = pnand %p1629_p3, %p48_p5  ;;  %s2083_s8 = int_to_ptr.vmem [resolvable:$true] %s197_s8 }
  0x4a   : > { %s2085_s9 = scalar_lea.sflag [#allocation3], %s186_s28  ;;  %s1778_s10 = scalar_lea.hbm %s2075_s7, 4096 }
  0x4b   : > { %p1779_p11 = scmp.ne.s32.totalorder %s2075_s7, %s1778_s10  ;;  %p1780_p12 = pneg %p2079_p2 }
  0x4c   : > { %s1783_s25 = scalar_lea.hbm %s2429_s0, 8192  ;;  %p1784_p4 = scmp.lt.u32.totalorder %s2075_s7, %s2429_s0 }
  0x4d   : > { %p1781_p0 = pnand %p1780_p12, %p1779_p11  ;;  %p1785_p13 = scmp.lt.u32.totalorder %s1783_s25, %s1778_s10 }
  0x4e   : > { %p1787_p10 = scmp.lt.u32.totalorder %s1778_s10, %s2075_s7 }
  0x4f   : > { %p1782_p1 = pneg %p1781_p0  ;;  %p1786_p6 = por %p1785_p13, %p1784_p4 }
  0x51   : > { %p1788_p3 = por %p1787_p10, %p1786_p6 }
  0x53   : > { %p1789_p5 = pnand %p1788_p3, %p1782_p1 }
  0x55   : > { %1792 = shalt.err (!%p1789_p5)
}
  0x56   : > { %s1793_s28 = scalar_lea.vmem %s2083_s8, 4096  ;;  %s1900_s5 = smov [#allocation2]  }
  0x57   : > { %p1794_p9 = scmp.ne.s32.totalorder %s2083_s8, %s1793_s28  ;;  %s1798_s6 = sshll.u32 %s1900_s5, 4  ;;  %s1799_s6 = int_to_ptr.vmem [resolvable:$false] %s1798_s6 }
  0x58   : > { %s1800_s21 = scalar_lea.vmem %s1799_s6, 8192  ;;  %p1801_p7 = scmp.lt.s32.totalorder %s2083_s8, %s1799_s6 }
  0x59   : > { %p1796_p11 = pnand %p1794_p9, %p1780_p12  ;;  %p1802_p4 = scmp.lt.s32.totalorder %s1800_s21, %s1793_s28 }
  0x5b   : > { %p1797_p0 = pneg %p1796_p11  ;;  %p1803_p13 = por %p1802_p4, %p1801_p7 }
  0x5d   : > { %p1804_p6 = pnand %p1803_p13, %p1797_p0 }
  0x5f   : > { %1807 = shalt.err (!%p1804_p6)
}
  0x60   : > { %s1901_s10 = smov 128   ;;  %s1902_s11 = smov 8  }
  0x61   : > { %1622 = dma.hbm_to_vmem [thread:$0]  (!%p2079_p2), %s2075_s7, 4096, %s2083_s8, %s2085_s9, %s1901_s10, %s1901_s10, %s1902_s11  }
  0x62   : > { %209 = sbr.rel (%p1981_p8) target bundleno = 465 (0x1d1), region = 32  ;;  %s2116_s19 = sand.u32 (!%p1981_p8), 1, %s1878_s13  }
  0x63   : > { %s1349_s25 = sshll.u32 (!%p1981_p8), %s2116_s19, 8  ;;  %s212_s29 = scalar_lea.sflag (!%p1981_p8), [#allocation3], %s2116_s19 }
  0x64   : > { %s2120_s30 = scalar_lea.vmem (!%p1981_p8), [#allocation2], %s1349_s25  ;;  %p2445_p7 = scmp.ne.s32.totalorder (!%p1981_p8), %s2439_s22, 0 }
  0x69   : > { %1861 = dma.done.wait (%p2445_p7), %s212_s29, 4096  }
  0x6a   : > { %1863 = vsyncadd (%p2445_p7), %s212_s29, 4294963200  ;;  %p2446_p2 = scmp.ne.s32.totalorder %s2437_s20, 0 }
  0x6c   : > { %1865 = dma.done.wait (%p2446_p2), [#allocation6], 3120  }
  0x6d   : > { %1867 = vsyncadd (%p2446_p2), [#allocation6], 4294964176  ;;  %v1903_v0 = vmov 0   ;;  %v1690_v1 = vld [vmem:[#allocation5 + $0x4] ss:$12 sps:$4 sm:$0xff]   ;;  %v253_v18 = vld [vmem:[%s2120_s30 + $0x8] sm:$0xff] }
  0x6e   : > { %509 = vmatprep.mubr.bf16.mxu0 %v1903_v0  ;;  %629 = vmatprep.mubr.bf16.mxu1 %v1903_v0  ;;  %v1692_v2 = vld [vmem:[#allocation5] ss:$12 sps:$4 sm:$0xff]   ;;  %v1693_v3 = vld [vmem:[#allocation5 + $0x1c] ss:$12 sps:$4 sm:$0xff]   ;;  %v1695_v4 = vld [vmem:[#allocation5 + $0x18] ss:$12 sps:$4 sm:$0xff]  }
  0x6f   : > { %477 = vmatprep.subr.bf16.mxu0 %v1690_v1  ;;  %1582 = vmatprep.subr.bf16.mxu1 %v1690_v1  ;;  %v1696_v5 = vld [vmem:[#allocation5 + $0x34] ss:$12 sps:$4 sm:$0xff]   ;;  %v1698_v6 = vld [vmem:[#allocation5 + $0x30] ss:$12 sps:$4 sm:$0xff]   ;;  %v1699_v7 = vld [vmem:[#allocation5 + $0x4c] ss:$12 sps:$4 sm:$0xff]  }
  0x70   : > { %478 = vmatpush1.bf16.msra.mxu0 %v1692_v2  ;;  %1590 = vmatpush1.bf16.msra.mxu1 %v1692_v2  ;;  %v1701_v8 = vld [vmem:[#allocation5 + $0x48] ss:$12 sps:$4 sm:$0xff]   ;;  %v1702_v9 = vld [vmem:[#allocation5 + $0x64] ss:$12 sps:$4 sm:$0xff]   ;;  %v1704_v10 = vld [vmem:[#allocation5 + $0x60] ss:$12 sps:$4 sm:$0xff]  }
  0x71   : > { %479 = vmatprep.subr.bf16.mxu0 %v1693_v3  ;;  %1583 = vmatprep.subr.bf16.mxu1 %v1693_v3  ;;  %v1705_v11 = vld [vmem:[#allocation5 + $0x7c] ss:$12 sps:$4 sm:$0xff]   ;;  %v1707_v12 = vld [vmem:[#allocation5 + $0x78] ss:$12 sps:$4 sm:$0xff]   ;;  %v1708_v13 = vld [vmem:[#allocation5 + $0x94] ss:$12 sps:$4 sm:$0xff]  }
  0x72   : > { %v1710_v14 = vld [vmem:[#allocation5 + $0x90] ss:$12 sps:$4 sm:$0xff]   ;;  %v1711_v15 = vld [vmem:[#allocation5 + $0xac] ss:$12 sps:$4 sm:$0xff]   ;;  %v1713_v16 = vld [vmem:[#allocation5 + $0xa8] ss:$12 sps:$4 sm:$0xff]  }
  0x73   : > { %v252_v17 = vld [vmem:[%s2120_s30] sm:$0xff]  ;;  %v277_v20 = vld [vmem:[%s2120_s30 + $0xc8] sm:$0xff]  ;;  %v254_v25 = vld [vmem:[%s2120_s30 + $0x10] sm:$0xff]  ;;  %s1598_s20 = smul.u32 384, %s2116_s19  ;;  %s1216_s9 = scalar_lea.sflag [#allocation4], %s2116_s19 }
  0x74   : > { %480 = vmatpush1.bf16.msra.mxu0 %v1695_v4  ;;  %1591 = vmatpush1.bf16.msra.mxu1 %v1695_v4  ;;  %v276_v19 = vld [vmem:[%s2120_s30 + $0xc0] sm:$0xff]  ;;  %v1714_v21 = vld [vmem:[#allocation5 + $0x8] ss:$12 sps:$4 sm:$0xff]   ;;  %v284_v22 = vpack.c.bf16 %v253_v18, %v252_v17  ;;  %v255_v26 = vld [vmem:[%s2120_s30 + $0x18] sm:$0xff]  ;;  %s1599_s24 = smul.u32 6144, %s1886_s15  ;;  %p2447_p12 = scmp.ne.s32.totalorder %s2443_s27, 0 }
  0x75   : > { %481 = vmatprep.subr.bf16.mxu0 %v1696_v5  ;;  %1584 = vmatprep.subr.bf16.mxu1 %v1696_v5  ;;  %v2136_v23 = vpack.c.bf16 %v277_v20, %v276_v19  ;;  %v1715_v24 = vld [vmem:[#allocation5 + $0x20] ss:$12 sps:$4 sm:$0xff]   ;;  %v278_v27 = vld [vmem:[%s2120_s30 + $0xd0] sm:$0xff]  ;;  %v279_v28 = vld [vmem:[%s2120_s30 + $0xd8] sm:$0xff]  ;;  %v285_v30 = vpack.c.bf16 %v255_v26, %v254_v25  ;;  %s2215_s22 = scalar_lea.vmem [#allocation8], %s1598_s20  ;;  %s1904_s5 = smov [#allocation8]  }
  0x76   : > { %v1716_v29 = vld [vmem:[#allocation5 + $0x38] ss:$12 sps:$4 sm:$0xff]   ;;  %v2145_v31 = vpack.c.bf16 %v279_v28, %v278_v27  ;;  %v1717_v32 = vld [vmem:[#allocation5 + $0x50] ss:$12 sps:$4 sm:$0xff]   ;;  %v257_v34 = vld [vmem:[%s2120_s30 + $0x28] sm:$0xff]  ;;  %s1232_s7 = sshll.u32 %s2215_s22, 4  ;;  %s2373_s26 = scalar_lea.hbm %s2432_s3, %s1599_s24  ;;  %s2375_s7 = int_to_ptr.vmem [resolvable:$true] %s1232_s7 }
  0x77   : > { %v256_v33 = vld [vmem:[%s2120_s30 + $0x20] sm:$0xff]  ;;  %v281_v36 = vld [vmem:[%s2120_s30 + $0xe8] sm:$0xff]  ;;  %v258_v41 = vld [vmem:[%s2120_s30 + $0x30] sm:$0xff]  ;;  %s1808_s28 = scalar_lea.vmem %s2375_s7, 6144  ;;  %s1812_s6 = sshll.u32 %s1904_s5, 4  ;;  %s1813_s6 = int_to_ptr.vmem [resolvable:$false] %s1812_s6 }
  0x78   : > { %482 = vmatpush1.bf16.msra.mxu0 %v1698_v6  ;;  %1592 = vmatpush1.bf16.msra.mxu1 %v1698_v6  ;;  %v280_v35 = vld [vmem:[%s2120_s30 + $0xe0] sm:$0xff]  ;;  %v1718_v37 = vld [vmem:[#allocation5 + $0x68] ss:$12 sps:$4 sm:$0xff]   ;;  %v286_v38 = vpack.c.bf16 %v257_v34, %v256_v33  ;;  %v259_v42 = vld [vmem:[%s2120_s30 + $0x38] sm:$0xff]  ;;  %p1809_p8 = scmp.ne.s32.totalorder %s2375_s7, %s1808_s28  ;;  %s1814_s21 = scalar_lea.vmem %s1813_s6, 12288 }
  0x79   : > { %483 = vmatprep.subr.bf16.mxu0 %v1699_v7  ;;  %1585 = vmatprep.subr.bf16.mxu1 %v1699_v7  ;;  %v2154_v39 = vpack.c.bf16 %v281_v36, %v280_v35  ;;  %v1719_v40 = vld [vmem:[#allocation5 + $0x80] ss:$12 sps:$4 sm:$0xff]   ;;  %v282_v43 = vld [vmem:[%s2120_s30 + $0xf0] sm:$0xff]  ;;  %v283_v44 = vld [vmem:[%s2120_s30 + $0xf8] sm:$0xff]  ;;  %v287_v46 = vpack.c.bf16 %v259_v42, %v258_v41  ;;  %p1815_p3 = scmp.lt.s32.totalorder %s2375_s7, %s1813_s6  ;;  %p1816_p5 = scmp.lt.s32.totalorder %s1814_s21, %s1808_s28 }
  0x7a   : > { %v1720_v45 = vld [vmem:[#allocation5 + $0x98] ss:$12 sps:$4 sm:$0xff]   ;;  %v2163_v47 = vpack.c.bf16 %v283_v44, %v282_v43  ;;  %v1721_v48 = vld [vmem:[#allocation5 + $0xb0] ss:$12 sps:$4 sm:$0xff]   ;;  %v261_v50 = vld [vmem:[%s2120_s30 + $0x48] sm:$0xff]  ;;  %p1810_p1 = pnand %p1809_p8, %p2447_p12 }
  0x7b   : > { %v260_v49 = vld [vmem:[%s2120_s30 + $0x40] sm:$0xff]  ;;  %v262_v52 = vld [vmem:[%s2120_s30 + $0x50] sm:$0xff]  ;;  %v263_v53 = vld [vmem:[%s2120_s30 + $0x58] sm:$0xff]  ;;  %p1817_p9 = por %p1816_p5, %p1815_p3 }
  0x7c   : > { %484 = vmatpush1.bf16.msra.mxu0 %v1701_v8  ;;  %1593 = vmatpush1.bf16.msra.mxu1 %v1701_v8  ;;  %v288_v51 = vpack.c.bf16 %v261_v50, %v260_v49  ;;  %v289_v54 = vpack.c.bf16 %v263_v53, %v262_v52  ;;  %v264_v55 = vld [vmem:[%s2120_s30 + $0x60] sm:$0xff]  ;;  %v265_v56 = vld [vmem:[%s2120_s30 + $0x68] sm:$0xff]  ;;  %v266_v58 = vld [vmem:[%s2120_s30 + $0x70] sm:$0xff]  ;;  %p1811_p10 = pneg %p1810_p1 }
  0x7d   : > { %485 = vmatprep.subr.bf16.mxu0 %v1702_v9  ;;  %1586 = vmatprep.subr.bf16.mxu1 %v1702_v9  ;;  %v290_v57 = vpack.c.bf16 %v265_v56, %v264_v55  ;;  %v267_v59 = vld [vmem:[%s2120_s30 + $0x78] sm:$0xff]  ;;  %v268_v60 = vld [vmem:[%s2120_s30 + $0x80] sm:$0xff]  ;;  %v269_v61 = vld [vmem:[%s2120_s30 + $0x88] sm:$0xff] }
  0x7e   : > { %v291_v62 = vpack.c.bf16 %v267_v59, %v266_v58  ;;  %v292_v63 = vpack.c.bf16 %v269_v61, %v268_v60  ;;  %v270_v1 = vld [vmem:[%s2120_s30 + $0x90] sm:$0xff]  ;;  %v271_v2 = vld [vmem:[%s2120_s30 + $0x98] sm:$0xff]  ;;  %v272_v3 = vld [vmem:[%s2120_s30 + $0xa0] sm:$0xff]  ;;  %p1818_p11 = pnand %p1817_p9, %p1811_p10 }
  0x7f   : > { %v273_v4 = vld [vmem:[%s2120_s30 + $0xa8] sm:$0xff]  ;;  %v293_v5 = vpack.c.bf16 %v271_v2, %v270_v1  ;;  %v274_v7 = vld [vmem:[%s2120_s30 + $0xb0] sm:$0xff]  ;;  %v275_v8 = vld [vmem:[%s2120_s30 + $0xb8] sm:$0xff] }
  0x80   : > { %486 = vmatpush1.bf16.msra.mxu0 %v1704_v10  ;;  %1594 = vmatpush1.bf16.msra.mxu1 %v1704_v10  ;;  %v294_v6 = vpack.c.bf16 %v273_v4, %v272_v3  ;;  %v295_v9 = vpack.c.bf16 %v275_v8, %v274_v7  ;;  %v334_v10 = vlaneseq }
  0x81   : > { %487 = vmatprep.subr.bf16.mxu0 %v1705_v11  ;;  %1587 = vmatprep.subr.bf16.mxu1 %v1705_v11 }
  0x82   : > { %v2194_v11 = vshrl.u32 %v334_v10, 7 }
  0x84   : > { %488 = vmatpush1.bf16.msra.mxu0 %v1707_v12  ;;  %1595 = vmatpush1.bf16.msra.mxu1 %v1707_v12  ;;  %v336_v12 = vsub.s32 0, %v2194_v11 }
  0x85   : > { %489 = vmatprep.subr.bf16.mxu0 %v1708_v13  ;;  %1588 = vmatprep.subr.bf16.mxu1 %v1708_v13  ;;  %v2197_v13 = vld [vmem:[#allocation7] sm:$0x7] }
  0x88   : > { %490 = vmatpush1.bf16.msra.mxu0 %v1710_v14  ;;  %1596 = vmatpush1.bf16.msra.mxu1 %v1710_v14  ;;  %v340_v14 = vsub.s32 1, %v2194_v11 }
  0x89   : > { %491 = vmatprep.subr.bf16.mxu0 %v1711_v15  ;;  %1589 = vmatprep.subr.bf16.mxu1 %v1711_v15  ;;  %v2201_v15 = vrot.slane %v2197_v13, %v336_v12 }
  0x8c   : > { %492 = vmatpush1.bf16.msra.mxu0 %v1713_v16  ;;  %1597 = vmatpush1.bf16.msra.mxu1 %v1713_v16  ;;  %v2204_v16 = vrot.slane %v2197_v13, %v340_v14 }
  0x8d   : > { %1534 = vmatprep.subr.bf16.mxu1 %v1714_v21 }
  0x8f   : > { %510 = vmatmul.mubr.bf16.vlgmr.msra.gmra.mrb[0].mxu0 %v284_v22  ;;  %630 = vmatmul.mubr.bf16.vlgmr.msra.gmra.mrb[0].mxu1 %v2136_v23 }
  0x90   : > { %1535 = vmatpush3.bf16.msra.mxu1 %v1714_v21  ;;  %519 = vmatprep.mubr.bf16.mxu0 %v1903_v0 }
  0x91   : > { %1536 = vmatprep.subr.bf16.mxu1 %v1715_v24  ;;  %639 = vmatprep.mubr.bf16.mxu1 %v1903_v0 }
  0x94   : > { %1537 = vmatpush3.bf16.msra.mxu1 %v1715_v24 }
  0x95   : > { %1538 = vmatprep.subr.bf16.mxu1 %v1716_v29 }
  0x97   : > { %520 = vmatmul.mubr.bf16.gmra.mrb[4].mxu0 %v285_v30  ;;  %640 = vmatmul.mubr.bf16.gmra.mrb[4].mxu1 %v2145_v31 }
  0x98   : > { %1539 = vmatpush3.bf16.msra.mxu1 %v1716_v29  ;;  %529 = vmatprep.mubr.bf16.mxu0 %v1903_v0 }
  0x99   : > { %1540 = vmatprep.subr.bf16.mxu1 %v1717_v32  ;;  %649 = vmatprep.mubr.bf16.mxu1 %v1903_v0 }
  0x9c   : > { %1541 = vmatpush3.bf16.msra.mxu1 %v1717_v32 }
  0x9d   : > { %1542 = vmatprep.subr.bf16.mxu1 %v1718_v37 }
  0x9f   : > { %530 = vmatmul.mubr.bf16.gmra.mrb[8].mxu0 %v286_v38  ;;  %650 = vmatmul.mubr.bf16.gmra.mrb[8].mxu1 %v2154_v39 }
  0xa0   : > { %1543 = vmatpush3.bf16.msra.mxu1 %v1718_v37  ;;  %539 = vmatprep.mubr.bf16.mxu0 %v1903_v0 }
  0xa1   : > { %1544 = vmatprep.subr.bf16.mxu1 %v1719_v40  ;;  %659 = vmatprep.mubr.bf16.mxu1 %v1903_v0 }
  0xa4   : > { %1545 = vmatpush3.bf16.msra.mxu1 %v1719_v40 }
  0xa5   : > { %1546 = vmatprep.subr.bf16.mxu1 %v1720_v45 }
  0xa7   : > { %540 = vmatmul.mubr.bf16.gmra.mrb[12].mxu0 %v287_v46  ;;  %660 = vmatmul.mubr.bf16.gmra.mrb[12].mxu1 %v2163_v47 }
  0xa8   : > { %1547 = vmatpush3.bf16.msra.mxu1 %v1720_v45  ;;  %549 = vmatprep.mubr.bf16.mxu0 %v1903_v0 }
  0xa9   : > { %1548 = vmatprep.subr.bf16.mxu1 %v1721_v48  ;;  %1550 = vmatprep.mubr.bf16.mxu1 %v284_v22 }
  0xac   : > { %1549 = vmatpush3.bf16.msra.mxu1 %v1721_v48 }
  0xaf   : > { %550 = vmatmul.mubr.bf16.gmra.mrb[16].mxu0 %v288_v51  ;;  %1551 = vmatmul.mubr.bf16.vlgmr.msra.gmra.mrb[16].mxu1 %v285_v30 }
  0xb0   : > { %559 = vmatprep.mubr.bf16.mxu0 %v1903_v0  ;;  %1554 = vmatprep.mubr.bf16.mxu1 %v286_v38 }
  0xb7   : > { %560 = vmatmul.mubr.bf16.gmra.mrb[20].mxu0 %v289_v54  ;;  %1555 = vmatmul.mubr.bf16.gmra.mrb[20].mxu1 %v287_v46 }
  0xb8   : > { %569 = vmatprep.mubr.bf16.mxu0 %v1903_v0  ;;  %1558 = vmatprep.mubr.bf16.mxu1 %v288_v51 }
  0xbf   : > { %570 = vmatmul.mubr.bf16.gmra.mrb[24].mxu0 %v290_v57  ;;  %1559 = vmatmul.mubr.bf16.gmra.mrb[24].mxu1 %v289_v54 }
  0xc0   : > { %579 = vmatprep.mubr.bf16.mxu0 %v1903_v0  ;;  %1562 = vmatprep.mubr.bf16.mxu1 %v290_v57 }
  0xc7   : > { %580 = vmatmul.mubr.bf16.gmra.mrb[28].mxu0 %v291_v62  ;;  %1563 = vmatmul.mubr.bf16.gmra.mrb[28].mxu1 %v291_v62 }
  0xc8   : > { %589 = vmatprep.mubr.bf16.mxu0 %v1903_v0  ;;  %1566 = vmatprep.mubr.bf16.mxu1 %v292_v63 }
  0xcf   : > { %590 = vmatmul.mubr.bf16.gmra.mrb[32].mxu0 %v292_v63  ;;  %1567 = vmatmul.mubr.bf16.gmra.mrb[32].mxu1 %v293_v5 }
  0xd0   : > { %599 = vmatprep.mubr.bf16.mxu0 %v1903_v0  ;;  %1570 = vmatprep.mubr.bf16.mxu1 %v294_v6 }
  0xd7   : > { %600 = vmatmul.mubr.bf16.gmra.mrb[36].mxu0 %v293_v5  ;;  %1571 = vmatmul.mubr.bf16.gmra.mrb[36].mxu1 %v295_v9 }
  0xd8   : > { %609 = vmatprep.mubr.bf16.mxu0 %v1903_v0  ;;  %1574 = vmatprep.mubr.bf16.mxu1 %v2136_v23 }
  0xdf   : > { %610 = vmatmul.mubr.bf16.gmra.mrb[40].mxu0 %v294_v6  ;;  %1575 = vmatmul.mubr.bf16.gmra.mrb[40].mxu1 %v2145_v31 }
  0xe0   : > { %619 = vmatprep.mubr.bf16.mxu0 %v1903_v0  ;;  %1578 = vmatprep.mubr.bf16.mxu1 %v2154_v39 }
  0xe7   : > { %620 = vmatmul.mubr.bf16.gmra.mrb[44].mxu0 %v295_v9  ;;  %1579 = vmatmul.mubr.bf16.gmra.mrb[44].mxu1 %v2163_v47 }
 0x162   : > { %v511_v0 = vpop.f32.mrb[0].mxu0  ;;  %v631_v17 = vpop.f32.mrb[0].mxu1 }
 0x163   : > { %v512_v18 = vadd.f32 %v511_v0, %v2201_v15  ;;  %v632_v19 = vadd.f32 %v631_v17, %v2201_v15  ;;  %v513_v20 = vpop.f32.mrb[1].mxu0  ;;  %v633_v21 = vpop.f32.mrb[1].mxu1 }
 0x164   : > { %v514_v22 = vadd.f32 %v513_v20, %v2204_v16  ;;  %v634_v23 = vadd.f32 %v633_v21, %v2204_v16  ;;  %v515_v24 = vpop.f32.mrb[2].mxu0  ;;  %v635_v25 = vpop.f32.mrb[2].mxu1 }
 0x165   : > { %v516_v26 = vadd.f32 %v515_v24, %v2201_v15  ;;  %v636_v27 = vadd.f32 %v635_v25, %v2201_v15  ;;  %v517_v28 = vpop.f32.mrb[3].mxu0  ;;  %v637_v29 = vpop.f32.mrb[3].mxu1 }
 0x166   : > { %v1446_v30 = vpack.c.bf16 %v514_v22, %v512_v18  ;;  %v1494_v31 = vpack.c.bf16 %v634_v23, %v632_v19  ;;  %v518_v32 = vadd.f32 %v517_v28, %v2204_v16  ;;  %v638_v33 = vadd.f32 %v637_v29, %v2204_v16 }
 0x167   : > { %v344_v22 = vsub.s32 2, %v2194_v11 }
 0x168   : > { %1151 = vst [vmem:[%s2215_s22] sm:$0xff] %v1446_v30  ;;  %1199 = vst [vmem:[%s2215_s22 + $0x120] sm:$0xff] %v1494_v31  ;;  %v1448_v34 = vpack.c.bf16 %v518_v32, %v516_v26  ;;  %v1496_v35 = vpack.c.bf16 %v638_v33, %v636_v27 }
 0x16a   : > { %1153 = vst [vmem:[%s2215_s22 + $0xc] sm:$0xff] %v1448_v34  ;;  %1201 = vst [vmem:[%s2215_s22 + $0x12c] sm:$0xff] %v1496_v35  ;;  %v521_v36 = vpop.f32.mrb[4].mxu0  ;;  %v641_v37 = vpop.f32.mrb[4].mxu1  ;;  %v2255_v34 = vrot.slane %v2197_v13, %v344_v22 }
 0x16b   : > { %v522_v38 = vadd.f32 %v521_v36, %v2201_v15  ;;  %v642_v39 = vadd.f32 %v641_v37, %v2201_v15  ;;  %v523_v40 = vpop.f32.mrb[5].mxu0  ;;  %v643_v41 = vpop.f32.mrb[5].mxu1 }
 0x16c   : > { %v524_v42 = vadd.f32 %v523_v40, %v2204_v16  ;;  %v644_v43 = vadd.f32 %v643_v41, %v2204_v16  ;;  %v525_v44 = vpop.f32.mrb[6].mxu0  ;;  %v645_v45 = vpop.f32.mrb[6].mxu1 }
 0x16d   : > { %v526_v46 = vadd.f32 %v525_v44, %v2201_v15  ;;  %v646_v47 = vadd.f32 %v645_v45, %v2201_v15  ;;  %v527_v48 = vpop.f32.mrb[7].mxu0  ;;  %v647_v49 = vpop.f32.mrb[7].mxu1 }
 0x16e   : > { %v1450_v50 = vpack.c.bf16 %v524_v42, %v522_v38  ;;  %v1498_v51 = vpack.c.bf16 %v644_v43, %v642_v39  ;;  %v528_v52 = vadd.f32 %v527_v48, %v2204_v16  ;;  %v648_v53 = vadd.f32 %v647_v49, %v2204_v16 }
 0x170   : > { %1155 = vst [vmem:[%s2215_s22 + $0x18] sm:$0xff] %v1450_v50  ;;  %1203 = vst [vmem:[%s2215_s22 + $0x138] sm:$0xff] %v1498_v51  ;;  %v1452_v54 = vpack.c.bf16 %v528_v52, %v526_v46  ;;  %v1500_v55 = vpack.c.bf16 %v648_v53, %v646_v47 }
 0x172   : > { %1157 = vst [vmem:[%s2215_s22 + $0x24] sm:$0xff] %v1452_v54  ;;  %1205 = vst [vmem:[%s2215_s22 + $0x144] sm:$0xff] %v1500_v55  ;;  %v531_v56 = vpop.f32.mrb[8].mxu0  ;;  %v651_v57 = vpop.f32.mrb[8].mxu1 }
 0x173   : > { %v532_v58 = vadd.f32 %v531_v56, %v2201_v15  ;;  %v652_v59 = vadd.f32 %v651_v57, %v2201_v15  ;;  %v533_v60 = vpop.f32.mrb[9].mxu0  ;;  %v653_v61 = vpop.f32.mrb[9].mxu1 }
 0x174   : > { %v534_v62 = vadd.f32 %v533_v60, %v2204_v16  ;;  %v654_v63 = vadd.f32 %v653_v61, %v2204_v16  ;;  %v535_v1 = vpop.f32.mrb[10].mxu0  ;;  %v655_v2 = vpop.f32.mrb[10].mxu1 }
 0x175   : > { %v536_v3 = vadd.f32 %v535_v1, %v2201_v15  ;;  %v656_v4 = vadd.f32 %v655_v2, %v2201_v15  ;;  %v537_v5 = vpop.f32.mrb[11].mxu0  ;;  %v657_v6 = vpop.f32.mrb[11].mxu1 }
 0x176   : > { %v1454_v7 = vpack.c.bf16 %v534_v62, %v532_v58  ;;  %v1502_v8 = vpack.c.bf16 %v654_v63, %v652_v59  ;;  %v538_v9 = vadd.f32 %v537_v5, %v2204_v16  ;;  %v658_v10 = vadd.f32 %v657_v6, %v2204_v16 }
 0x178   : > { %1159 = vst [vmem:[%s2215_s22 + $0x30] sm:$0xff] %v1454_v7  ;;  %1207 = vst [vmem:[%s2215_s22 + $0x150] sm:$0xff] %v1502_v8  ;;  %v1456_v12 = vpack.c.bf16 %v538_v9, %v536_v3  ;;  %v1504_v14 = vpack.c.bf16 %v658_v10, %v656_v4 }
 0x17a   : > { %1161 = vst [vmem:[%s2215_s22 + $0x3c] sm:$0xff] %v1456_v12  ;;  %1209 = vst [vmem:[%s2215_s22 + $0x15c] sm:$0xff] %v1504_v14  ;;  %v541_v0 = vpop.f32.mrb[12].mxu0  ;;  %v661_v17 = vpop.f32.mrb[12].mxu1 }
 0x17b   : > { %v542_v18 = vadd.f32 %v541_v0, %v2201_v15  ;;  %v662_v19 = vadd.f32 %v661_v17, %v2201_v15  ;;  %v543_v20 = vpop.f32.mrb[13].mxu0  ;;  %v663_v21 = vpop.f32.mrb[13].mxu1 }
 0x17c   : > { %v544_v23 = vadd.f32 %v543_v20, %v2204_v16  ;;  %v664_v24 = vadd.f32 %v663_v21, %v2204_v16  ;;  %v545_v25 = vpop.f32.mrb[14].mxu0  ;;  %v665_v26 = vpop.f32.mrb[14].mxu1 }
 0x17d   : > { %v546_v27 = vadd.f32 %v545_v25, %v2201_v15  ;;  %v666_v28 = vadd.f32 %v665_v26, %v2201_v15  ;;  %v547_v29 = vpop.f32.mrb[15].mxu0  ;;  %v667_v30 = vpop.f32.mrb[15].mxu1 }
 0x17e   : > { %v1458_v31 = vpack.c.bf16 %v544_v23, %v542_v18  ;;  %v1506_v32 = vpack.c.bf16 %v664_v24, %v662_v19  ;;  %v548_v33 = vadd.f32 %v547_v29, %v2204_v16  ;;  %v668_v11 = vadd.f32 %v667_v30, %v2204_v16 }
 0x180   : > { %1163 = vst [vmem:[%s2215_s22 + $0x48] sm:$0xff] %v1458_v31  ;;  %1211 = vst [vmem:[%s2215_s22 + $0x168] sm:$0xff] %v1506_v32  ;;  %v1460_v35 = vpack.c.bf16 %v548_v33, %v546_v27  ;;  %v1508_v36 = vpack.c.bf16 %v668_v11, %v666_v28 }
 0x182   : > { %1165 = vst [vmem:[%s2215_s22 + $0x54] sm:$0xff] %v1460_v35  ;;  %1213 = vst [vmem:[%s2215_s22 + $0x174] sm:$0xff] %v1508_v36  ;;  %v551_v37 = vpop.f32.mrb[16].mxu0  ;;  %v1552_v38 = vpop.f32.mrb[16].mxu1 }
 0x183   : > { %v552_v39 = vadd.f32 %v551_v37, %v2201_v15  ;;  %v713_v40 = vadd.f32 %v1552_v38, %v2255_v34  ;;  %v553_v41 = vpop.f32.mrb[17].mxu0  ;;  %v704_v42 = vpop.f32.mrb[17].mxu1 }
 0x184   : > { %v554_v43 = vadd.f32 %v553_v41, %v2204_v16  ;;  %v705_v13 = vadd.f32 %v704_v42, %v2255_v34  ;;  %v555_v44 = vpop.f32.mrb[18].mxu0  ;;  %v1553_v45 = vpop.f32.mrb[18].mxu1 }
 0x185   : > { %v1451_v46 = vpack.c.bf16 %v713_v40, %v713_v40  ;;  %v556_v47 = vadd.f32 %v555_v44, %v2201_v15  ;;  %v716_v48 = vadd.f32 %v1553_v45, %v2255_v34  ;;  %v557_v49 = vpop.f32.mrb[19].mxu0  ;;  %v707_v50 = vpop.f32.mrb[19].mxu1 }
 0x186   : > { %v1462_v51 = vpack.c.bf16 %v554_v43, %v552_v39  ;;  %v1447_v52 = vpack.c.bf16 %v705_v13, %v705_v13  ;;  %v558_v53 = vadd.f32 %v557_v49, %v2204_v16  ;;  %v708_v54 = vadd.f32 %v707_v50, %v2255_v34 }
 0x187   : > { %1156 = vst [vmem:[%s2215_s22 + $0x20] sm:$0xf] %v1451_v46  ;;  %v1453_v55 = vpack.c.bf16 %v716_v48, %v716_v48 }
 0x188   : > { %1167 = vst [vmem:[%s2215_s22 + $0x60] sm:$0xff] %v1462_v51  ;;  %1152 = vst [vmem:[%s2215_s22 + $0x8] sm:$0xf] %v1447_v52  ;;  %v1464_v56 = vpack.c.bf16 %v558_v53, %v556_v47  ;;  %v1449_v57 = vpack.c.bf16 %v708_v54, %v708_v54 }
 0x189   : > { %1158 = vst [vmem:[%s2215_s22 + $0x2c] sm:$0xf] %v1453_v55 }
 0x18a   : > { %1169 = vst [vmem:[%s2215_s22 + $0x6c] sm:$0xff] %v1464_v56  ;;  %1154 = vst [vmem:[%s2215_s22 + $0x14] sm:$0xf] %v1449_v57  ;;  %v561_v58 = vpop.f32.mrb[20].mxu0  ;;  %v1556_v59 = vpop.f32.mrb[20].mxu1 }
 0x18b   : > { %v562_v60 = vadd.f32 %v561_v58, %v2201_v15  ;;  %v729_v61 = vadd.f32 %v1556_v59, %v2255_v34  ;;  %v563_v62 = vpop.f32.mrb[21].mxu0  ;;  %v720_v63 = vpop.f32.mrb[21].mxu1 }
 0x18c   : > { %v564_v1 = vadd.f32 %v563_v62, %v2204_v16  ;;  %v721_v2 = vadd.f32 %v720_v63, %v2255_v34  ;;  %v565_v3 = vpop.f32.mrb[22].mxu0  ;;  %v1557_v4 = vpop.f32.mrb[22].mxu1 }
 0x18d   : > { %v1459_v5 = vpack.c.bf16 %v729_v61, %v729_v61  ;;  %v566_v6 = vadd.f32 %v565_v3, %v2201_v15  ;;  %v732_v7 = vadd.f32 %v1557_v4, %v2255_v34  ;;  %v567_v8 = vpop.f32.mrb[23].mxu0  ;;  %v723_v9 = vpop.f32.mrb[23].mxu1 }
 0x18e   : > { %v1466_v10 = vpack.c.bf16 %v564_v1, %v562_v60  ;;  %v1455_v12 = vpack.c.bf16 %v721_v2, %v721_v2  ;;  %v568_v14 = vadd.f32 %v567_v8, %v2204_v16  ;;  %v724_v0 = vadd.f32 %v723_v9, %v2255_v34 }
 0x18f   : > { %1164 = vst [vmem:[%s2215_s22 + $0x50] sm:$0xf] %v1459_v5  ;;  %v1461_v17 = vpack.c.bf16 %v732_v7, %v732_v7 }
 0x190   : > { %1171 = vst [vmem:[%s2215_s22 + $0x78] sm:$0xff] %v1466_v10  ;;  %1160 = vst [vmem:[%s2215_s22 + $0x38] sm:$0xf] %v1455_v12  ;;  %v1468_v18 = vpack.c.bf16 %v568_v14, %v566_v6  ;;  %v1457_v19 = vpack.c.bf16 %v724_v0, %v724_v0 }
 0x191   : > { %1166 = vst [vmem:[%s2215_s22 + $0x5c] sm:$0xf] %v1461_v17 }
 0x192   : > { %1173 = vst [vmem:[%s2215_s22 + $0x84] sm:$0xff] %v1468_v18  ;;  %1162 = vst [vmem:[%s2215_s22 + $0x44] sm:$0xf] %v1457_v19  ;;  %v571_v20 = vpop.f32.mrb[24].mxu0  ;;  %v1560_v21 = vpop.f32.mrb[24].mxu1 }
 0x193   : > { %v572_v22 = vadd.f32 %v571_v20, %v2201_v15  ;;  %v745_v23 = vadd.f32 %v1560_v21, %v2255_v34  ;;  %v573_v24 = vpop.f32.mrb[25].mxu0  ;;  %v736_v25 = vpop.f32.mrb[25].mxu1 }
 0x194   : > { %v574_v26 = vadd.f32 %v573_v24, %v2204_v16  ;;  %v737_v27 = vadd.f32 %v736_v25, %v2255_v34  ;;  %v575_v28 = vpop.f32.mrb[26].mxu0  ;;  %v1561_v29 = vpop.f32.mrb[26].mxu1 }
 0x195   : > { %v1467_v30 = vpack.c.bf16 %v745_v23, %v745_v23  ;;  %v576_v31 = vadd.f32 %v575_v28, %v2201_v15  ;;  %v748_v32 = vadd.f32 %v1561_v29, %v2255_v34  ;;  %v577_v33 = vpop.f32.mrb[27].mxu0  ;;  %v739_v11 = vpop.f32.mrb[27].mxu1 }
 0x196   : > { %v1470_v35 = vpack.c.bf16 %v574_v26, %v572_v22  ;;  %v1463_v36 = vpack.c.bf16 %v737_v27, %v737_v27  ;;  %v578_v37 = vadd.f32 %v577_v33, %v2204_v16  ;;  %v740_v38 = vadd.f32 %v739_v11, %v2255_v34 }
 0x197   : > { %1172 = vst [vmem:[%s2215_s22 + $0x80] sm:$0xf] %v1467_v30  ;;  %v1469_v39 = vpack.c.bf16 %v748_v32, %v748_v32 }
 0x198   : > { %1175 = vst [vmem:[%s2215_s22 + $0x90] sm:$0xff] %v1470_v35  ;;  %1168 = vst [vmem:[%s2215_s22 + $0x68] sm:$0xf] %v1463_v36  ;;  %v1472_v40 = vpack.c.bf16 %v578_v37, %v576_v31  ;;  %v1465_v41 = vpack.c.bf16 %v740_v38, %v740_v38 }
 0x199   : > { %1174 = vst [vmem:[%s2215_s22 + $0x8c] sm:$0xf] %v1469_v39 }
 0x19a   : > { %1177 = vst [vmem:[%s2215_s22 + $0x9c] sm:$0xff] %v1472_v40  ;;  %1170 = vst [vmem:[%s2215_s22 + $0x74] sm:$0xf] %v1465_v41  ;;  %v581_v42 = vpop.f32.mrb[28].mxu0  ;;  %v1564_v43 = vpop.f32.mrb[28].mxu1 }
 0x19b   : > { %v582_v13 = vadd.f32 %v581_v42, %v2201_v15  ;;  %v761_v44 = vadd.f32 %v1564_v43, %v2255_v34  ;;  %v583_v45 = vpop.f32.mrb[29].mxu0  ;;  %v752_v46 = vpop.f32.mrb[29].mxu1 }
 0x19c   : > { %v584_v47 = vadd.f32 %v583_v45, %v2204_v16  ;;  %v753_v48 = vadd.f32 %v752_v46, %v2255_v34  ;;  %v585_v49 = vpop.f32.mrb[30].mxu0  ;;  %v1565_v50 = vpop.f32.mrb[30].mxu1 }
 0x19d   : > { %v1475_v51 = vpack.c.bf16 %v761_v44, %v761_v44  ;;  %v586_v52 = vadd.f32 %v585_v49, %v2201_v15  ;;  %v764_v53 = vadd.f32 %v1565_v50, %v2255_v34  ;;  %v587_v54 = vpop.f32.mrb[31].mxu0  ;;  %v755_v55 = vpop.f32.mrb[31].mxu1 }
 0x19e   : > { %v1474_v56 = vpack.c.bf16 %v584_v47, %v582_v13  ;;  %v1471_v57 = vpack.c.bf16 %v753_v48, %v753_v48  ;;  %v588_v58 = vadd.f32 %v587_v54, %v2204_v16  ;;  %v756_v59 = vadd.f32 %v755_v55, %v2255_v34 }
 0x19f   : > { %1180 = vst [vmem:[%s2215_s22 + $0xb0] sm:$0xf] %v1475_v51  ;;  %v1477_v60 = vpack.c.bf16 %v764_v53, %v764_v53 }
 0x1a0   : > { %1179 = vst [vmem:[%s2215_s22 + $0xa8] sm:$0xff] %v1474_v56  ;;  %1176 = vst [vmem:[%s2215_s22 + $0x98] sm:$0xf] %v1471_v57  ;;  %v1476_v61 = vpack.c.bf16 %v588_v58, %v586_v52  ;;  %v1473_v62 = vpack.c.bf16 %v756_v59, %v756_v59 }
 0x1a1   : > { %1182 = vst [vmem:[%s2215_s22 + $0xbc] sm:$0xf] %v1477_v60 }
 0x1a2   : > { %1181 = vst [vmem:[%s2215_s22 + $0xb4] sm:$0xff] %v1476_v61  ;;  %1178 = vst [vmem:[%s2215_s22 + $0xa4] sm:$0xf] %v1473_v62  ;;  %v591_v63 = vpop.f32.mrb[32].mxu0  ;;  %v1568_v1 = vpop.f32.mrb[32].mxu1 }
 0x1a3   : > { %v592_v2 = vadd.f32 %v591_v63, %v2201_v15  ;;  %v777_v3 = vadd.f32 %v1568_v1, %v2255_v34  ;;  %v593_v4 = vpop.f32.mrb[33].mxu0  ;;  %v768_v5 = vpop.f32.mrb[33].mxu1 }
 0x1a4   : > { %v594_v6 = vadd.f32 %v593_v4, %v2204_v16  ;;  %v769_v7 = vadd.f32 %v768_v5, %v2255_v34  ;;  %v595_v8 = vpop.f32.mrb[34].mxu0  ;;  %v1569_v9 = vpop.f32.mrb[34].mxu1 }
 0x1a5   : > { %v1483_v10 = vpack.c.bf16 %v777_v3, %v777_v3  ;;  %v596_v12 = vadd.f32 %v595_v8, %v2201_v15  ;;  %v780_v14 = vadd.f32 %v1569_v9, %v2255_v34  ;;  %v597_v0 = vpop.f32.mrb[35].mxu0  ;;  %v771_v17 = vpop.f32.mrb[35].mxu1 }
 0x1a6   : > { %v1478_v18 = vpack.c.bf16 %v594_v6, %v592_v2  ;;  %v1479_v19 = vpack.c.bf16 %v769_v7, %v769_v7  ;;  %v598_v20 = vadd.f32 %v597_v0, %v2204_v16  ;;  %v772_v21 = vadd.f32 %v771_v17, %v2255_v34 }
 0x1a7   : > { %1188 = vst [vmem:[%s2215_s22 + $0xe0] sm:$0xf] %v1483_v10  ;;  %v1485_v22 = vpack.c.bf16 %v780_v14, %v780_v14 }
 0x1a8   : > { %1183 = vst [vmem:[%s2215_s22 + $0xc0] sm:$0xff] %v1478_v18  ;;  %1184 = vst [vmem:[%s2215_s22 + $0xc8] sm:$0xf] %v1479_v19  ;;  %v1480_v23 = vpack.c.bf16 %v598_v20, %v596_v12  ;;  %v1481_v24 = vpack.c.bf16 %v772_v21, %v772_v21 }
 0x1a9   : > { %1190 = vst [vmem:[%s2215_s22 + $0xec] sm:$0xf] %v1485_v22 }
 0x1aa   : > { %1185 = vst [vmem:[%s2215_s22 + $0xcc] sm:$0xff] %v1480_v23  ;;  %1186 = vst [vmem:[%s2215_s22 + $0xd4] sm:$0xf] %v1481_v24  ;;  %v601_v25 = vpop.f32.mrb[36].mxu0  ;;  %v1572_v26 = vpop.f32.mrb[36].mxu1 }
 0x1ab   : > { %v602_v27 = vadd.f32 %v601_v25, %v2201_v15  ;;  %v793_v28 = vadd.f32 %v1572_v26, %v2255_v34  ;;  %v603_v29 = vpop.f32.mrb[37].mxu0  ;;  %v784_v30 = vpop.f32.mrb[37].mxu1 }
 0x1ac   : > { %v604_v31 = vadd.f32 %v603_v29, %v2204_v16  ;;  %v785_v32 = vadd.f32 %v784_v30, %v2255_v34  ;;  %v605_v33 = vpop.f32.mrb[38].mxu0  ;;  %v1573_v11 = vpop.f32.mrb[38].mxu1 }
 0x1ad   : > { %v1491_v35 = vpack.c.bf16 %v793_v28, %v793_v28  ;;  %v606_v36 = vadd.f32 %v605_v33, %v2201_v15  ;;  %v796_v37 = vadd.f32 %v1573_v11, %v2255_v34  ;;  %v607_v38 = vpop.f32.mrb[39].mxu0  ;;  %v787_v39 = vpop.f32.mrb[39].mxu1 }
 0x1ae   : > { %v1482_v40 = vpack.c.bf16 %v604_v31, %v602_v27  ;;  %v1487_v41 = vpack.c.bf16 %v785_v32, %v785_v32  ;;  %v608_v42 = vadd.f32 %v607_v38, %v2204_v16  ;;  %v788_v43 = vadd.f32 %v787_v39, %v2255_v34 }
 0x1af   : > { %1196 = vst [vmem:[%s2215_s22 + $0x110] sm:$0xf] %v1491_v35  ;;  %v1493_v13 = vpack.c.bf16 %v796_v37, %v796_v37 }
 0x1b0   : > { %1187 = vst [vmem:[%s2215_s22 + $0xd8] sm:$0xff] %v1482_v40  ;;  %1192 = vst [vmem:[%s2215_s22 + $0xf8] sm:$0xf] %v1487_v41  ;;  %v1484_v44 = vpack.c.bf16 %v608_v42, %v606_v36  ;;  %v1489_v45 = vpack.c.bf16 %v788_v43, %v788_v43 }
 0x1b1   : > { %1198 = vst [vmem:[%s2215_s22 + $0x11c] sm:$0xf] %v1493_v13 }
 0x1b2   : > { %1189 = vst [vmem:[%s2215_s22 + $0xe4] sm:$0xff] %v1484_v44  ;;  %1194 = vst [vmem:[%s2215_s22 + $0x104] sm:$0xf] %v1489_v45  ;;  %v611_v46 = vpop.f32.mrb[40].mxu0  ;;  %v1576_v47 = vpop.f32.mrb[40].mxu1 }
 0x1b3   : > { %v612_v48 = vadd.f32 %v611_v46, %v2201_v15  ;;  %v809_v49 = vadd.f32 %v1576_v47, %v2255_v34  ;;  %v613_v50 = vpop.f32.mrb[41].mxu0  ;;  %v800_v51 = vpop.f32.mrb[41].mxu1 }
 0x1b4   : > { %v614_v52 = vadd.f32 %v613_v50, %v2204_v16  ;;  %v801_v53 = vadd.f32 %v800_v51, %v2255_v34  ;;  %v615_v54 = vpop.f32.mrb[42].mxu0  ;;  %v1577_v55 = vpop.f32.mrb[42].mxu1 }
 0x1b5   : > { %v1499_v56 = vpack.c.bf16 %v809_v49, %v809_v49  ;;  %v616_v57 = vadd.f32 %v615_v54, %v2201_v15  ;;  %v812_v58 = vadd.f32 %v1577_v55, %v2255_v34  ;;  %v617_v59 = vpop.f32.mrb[43].mxu0  ;;  %v803_v60 = vpop.f32.mrb[43].mxu1 }
 0x1b6   : > { %v1486_v61 = vpack.c.bf16 %v614_v52, %v612_v48  ;;  %v1495_v62 = vpack.c.bf16 %v801_v53, %v801_v53  ;;  %v618_v63 = vadd.f32 %v617_v59, %v2204_v16  ;;  %v804_v1 = vadd.f32 %v803_v60, %v2255_v34 }
 0x1b7   : > { %1204 = vst [vmem:[%s2215_s22 + $0x140] sm:$0xf] %v1499_v56  ;;  %v1501_v2 = vpack.c.bf16 %v812_v58, %v812_v58 }
 0x1b8   : > { %1191 = vst [vmem:[%s2215_s22 + $0xf0] sm:$0xff] %v1486_v61  ;;  %1200 = vst [vmem:[%s2215_s22 + $0x128] sm:$0xf] %v1495_v62  ;;  %v1488_v3 = vpack.c.bf16 %v618_v63, %v616_v57  ;;  %v1497_v4 = vpack.c.bf16 %v804_v1, %v804_v1 }
 0x1b9   : > { %1206 = vst [vmem:[%s2215_s22 + $0x14c] sm:$0xf] %v1501_v2 }
 0x1ba   : > { %1193 = vst [vmem:[%s2215_s22 + $0xfc] sm:$0xff] %v1488_v3  ;;  %1202 = vst [vmem:[%s2215_s22 + $0x134] sm:$0xf] %v1497_v4  ;;  %v621_v5 = vpop.f32.mrb[44].mxu0  ;;  %v1580_v6 = vpop.f32.mrb[44].mxu1 }
 0x1bb   : > { %v622_v7 = vadd.f32 %v621_v5, %v2201_v15  ;;  %v825_v8 = vadd.f32 %v1580_v6, %v2255_v34  ;;  %v623_v9 = vpop.f32.mrb[45].mxu0  ;;  %v816_v10 = vpop.f32.mrb[45].mxu1 }
 0x1bc   : > { %v624_v12 = vadd.f32 %v623_v9, %v2204_v16  ;;  %v817_v14 = vadd.f32 %v816_v10, %v2255_v34  ;;  %v625_v0 = vpop.f32.mrb[46].mxu0  ;;  %v1581_v17 = vpop.f32.mrb[46].mxu1 }
 0x1bd   : > { %v1507_v18 = vpack.c.bf16 %v825_v8, %v825_v8  ;;  %v626_v19 = vadd.f32 %v625_v0, %v2201_v15  ;;  %v828_v20 = vadd.f32 %v1581_v17, %v2255_v34  ;;  %v627_v21 = vpop.f32.mrb[47].mxu0  ;;  %v819_v22 = vpop.f32.mrb[47].mxu1 }
 0x1be   : > { %v1490_v23 = vpack.c.bf16 %v624_v12, %v622_v7  ;;  %v1503_v24 = vpack.c.bf16 %v817_v14, %v817_v14  ;;  %v628_v25 = vadd.f32 %v627_v21, %v2204_v16  ;;  %v820_v26 = vadd.f32 %v819_v22, %v2255_v34 }
 0x1bf   : > { %1212 = vst [vmem:[%s2215_s22 + $0x170] sm:$0xf] %v1507_v18  ;;  %v1509_v27 = vpack.c.bf16 %v828_v20, %v828_v20 }
 0x1c0   : > { %1195 = vst [vmem:[%s2215_s22 + $0x108] sm:$0xff] %v1490_v23  ;;  %1208 = vst [vmem:[%s2215_s22 + $0x158] sm:$0xf] %v1503_v24  ;;  %v1492_v15 = vpack.c.bf16 %v628_v25, %v626_v19  ;;  %v1505_v28 = vpack.c.bf16 %v820_v26, %v820_v26 }
 0x1c1   : > { %1214 = vst [vmem:[%s2215_s22 + $0x17c] sm:$0xf] %v1509_v27 }
 0x1c2   : > { %1197 = vst [vmem:[%s2215_s22 + $0x114] sm:$0xff] %v1492_v15  ;;  %1210 = vst [vmem:[%s2215_s22 + $0x164] sm:$0xf] %v1505_v28 }
 0x1c3   : > { %1821 = shalt.err (!%p1818_p11)
}
 0x1c4   : > { %s1822_s10 = scalar_lea.hbm %s2373_s26, 6144  ;;  %s1826_s29 = scalar_lea.hbm %s2432_s3, 12288 }
 0x1c5   : > { %p1823_p0 = scmp.ne.s32.totalorder %s2373_s26, %s1822_s10  ;;  %p1827_p6 = scmp.lt.u32.totalorder %s2373_s26, %s2432_s3 }
 0x1c6   : > { %p1828_p7 = scmp.lt.u32.totalorder %s1826_s29, %s1822_s10  ;;  %p1830_p8 = scmp.lt.u32.totalorder %s1822_s10, %s2373_s26 }
 0x1c7   : > { %p1824_p4 = pnand %p1823_p0, %p2447_p12 }
 0x1c8   : > { %p1829_p2 = por %p1828_p7, %p1827_p6 }
 0x1c9   : > { %p1825_p13 = pneg %p1824_p4 }
 0x1ca   : > { %p1831_p1 = por %p1830_p8, %p1829_p2 }
 0x1cc   : > { %p1832_p10 = pnand %p1831_p1, %p1825_p13 }
 0x1ce   : > { %1835 = shalt.err (!%p1832_p10)
}
 0x1cf   : > { %s1905_s22 = smov 192   ;;  %s1906_s24 = smov 12  }
 0x1d0   : > { %1610 = dma.vmem_to_hbm [thread:$0]  (%p2447_p12), %s2375_s7, 6144, %s2373_s26, %s1216_s9, %s1905_s22, %s1905_s22, %s1906_s24  }
 0x1d1 PF: > { %s1247_s15 = sand.u32 1, %s1874_s12   ;;  %p2448_p3 = scmp.ne.s32.totalorder %s2440_s23, 0 }
 0x1d2   : > { %p2449_p5 = scmp.ge.s32.totalorder %s1894_s17, 2  ;;  %s1248_s8 = scalar_lea.sflag [#allocation4], %s1247_s15 }
 0x1d4   : > { %p1624_p9 = pnand %p2449_p5, %p2448_p3 }
 0x1d6   : > { %1869 = dma.done.wait (!%p1624_p9), %s1248_s8, 6144  }
 0x1d7   : > { %1871 = vsyncadd (!%p1624_p9), %s1248_s8, 4294961152  ;;  %s20_s17 = sadd.s32 1, %s1894_s17   ;;  %s2450_s12 = smov %s1878_s13 }
 0x1d8   : > { %p17_p11 = scmp.ge.s32.totalorder %s20_s17, 4   ;;  %s2451_s13 = smov %s1882_s14 }
 0x1d9   : > { %s2452_s14 = smov %s2070_s4  ;;  %s2453_s15 = smov %s1890_s16 }
 0x1da   : > { %s2454_s16 = smov %s2456_s18  ;;  %19 = sbr.rel (!%p17_p11) target bundleno = 7 (0x7), region = 87 }
 0x1e1   :  { %1253 = vsyncpa [#allocation3], 1 }
 0x1e2   :  { %1255 = vsyncpa [#allocation3 + $0x1], 1 }
 0x1e3   :  { %1256 = vsyncpa [#allocation6], 1 }
 0x1e4   :  { %1257 = vsyncpa [#allocation4], 1 }
 0x1e5   :  { %1259 = vsyncpa [#allocation4 + $0x1], 1 }

</bundles_post_ra>
